<compile_context>
chip_gen: v7x
topology: tpu7x:2x2x1
jax: 0.10.0
libtpu: 0.0.40
codegen_flags: <defaults>
</compile_context>

<pallas_src>
import functools

import jax
import jax.numpy as jnp
from jax.experimental import pallas as pl
from jax.experimental.pallas import tpu as pltpu

# ---- module hyper-parameters (small, consistent with the transformer it comes from) ----
HID_DIM = 32
PF_DIM = 64
B = 2
S = 8

LANES = 128      # TPU vreg lane width; feature dims are zero-padded to this inside params.
SUBLANES = 8


def _round_up(n, m):
    return ((n + m - 1) // m) * m


# ---------------------------------------------------------------------------
# Parameter packing: one lane-dense array, built once and reused across calls.
# ---------------------------------------------------------------------------
def pack_ffn_params(w1, b1, w2, b2):
    """Pack fc_1 / fc_2 weights + biases into ONE (P, 128) f32 array.

    Layout (all sublane offsets 8-aligned, all real data zero-padded to 128 lanes):
      rows [0, hid)                : w1 (hid, pf)  in cols [0, pf)
      rows [w2_off, w2_off + 128)  : w2 (pf, hid)  in rows [0, pf), cols [0, hid)
      row  b1_off                  : b1 in cols [0, pf)
      row  b2_off                  : b2 in cols [0, hid)
    The zero padding is mathematically inert (padded h lanes are relu(0)=0 and padded
    w2 rows/cols are 0), so results in lanes [0, hid) are exact.
    """
    hid, pf = w1.shape
    assert hid <= LANES and pf <= LANES, "packing assumes hid, pf <= 128"
    assert w2.shape == (pf, hid) and b1.shape == (pf,) and b2.shape == (hid,)

    w2_off = _round_up(hid, SUBLANES)
    b1_off = w2_off + LANES
    b2_off = b1_off + SUBLANES
    total = b2_off + SUBLANES

    p = jnp.zeros((total, LANES), jnp.float32)
    p = p.at[:hid, :pf].set(w1.astype(jnp.float32))
    p = p.at[w2_off:w2_off + pf, :hid].set(w2.astype(jnp.float32))
    p = p.at[b1_off, :pf].set(b1.astype(jnp.float32))
    p = p.at[b2_off, :hid].set(b2.astype(jnp.float32))
    meta = dict(hid=hid, pf=pf, w2_off=w2_off, b1_off=b1_off, b2_off=b2_off)
    return p, meta


# ---------------------------------------------------------------------------
# Kernel: fused fc_1 -> ReLU -> fc_2 on one row tile (all lane-dense)
# ---------------------------------------------------------------------------
def ffn_kernel(x_ref, p_ref, o_ref, *, hid, w2_off, b1_off, b2_off):
    # x_ref: (bm, hid)   p_ref: (P, 128) packed params   o_ref: (bm, 128)
    x = x_ref[...]
    w1 = p_ref[0:hid, :]                        # (hid, 128)  static view
    w2 = p_ref[w2_off:w2_off + LANES, :]        # (128, 128)
    b1 = p_ref[b1_off:b1_off + 1, :]            # (1, 128)
    b2 = p_ref[b2_off:b2_off + 1, :]            # (1, 128)

    h = jnp.dot(x, w1, preferred_element_type=jnp.float32) + b1   # fc_1 (MXU)
    h = jnp.maximum(h, 0.0)                                       # ReLU; dropout = identity
    o_ref[...] = jnp.dot(h, w2, preferred_element_type=jnp.float32) + b2   # fc_2 (MXU)


# ---------------------------------------------------------------------------
# Wrapper
# ---------------------------------------------------------------------------
def positionwise_ffn(x, packed_params, meta, *, max_block_rows=512):
    """x: (..., hid) f32. packed_params/meta from pack_ffn_params. Returns (..., hid)."""
    hid, pf = meta["hid"], meta["pf"]
    assert x.shape[-1] == hid
    lead = x.shape[:-1]

    x2d = x.reshape(-1, hid)                    # contiguous -> free
    rows = x2d.shape[0]

    # Row tile: >=2 blocks so both v7x TensorCores get work; capped so VMEM stays
    # small even on v7x (64 MiB).  Last block may be partial (OOB writes are masked).
    bm = _round_up(pl.cdiv(rows, 2), SUBLANES)
    bm = max(SUBLANES, min(bm, max_block_rows))
    grid = (pl.cdiv(rows, bm),)

    kernel = functools.partial(
        ffn_kernel, hid=hid,
        w2_off=meta["w2_off"], b1_off=meta["b1_off"], b2_off=meta["b2_off"])

    cost = pl.CostEstimate(
        flops=2 * rows * (hid * pf + pf * hid),
        bytes_accessed=4 * (rows * hid + packed_params.size + rows * LANES),
        transcendentals=0,
    )

    out_pad = pl.pallas_call(
        kernel,
        out_shape=jax.ShapeDtypeStruct((rows, LANES), jnp.float32),
        grid_spec=pltpu.PrefetchScalarGridSpec(
            num_scalar_prefetch=0,
            grid=grid,
            in_specs=[
                pl.BlockSpec((bm, hid), lambda i: (i, 0)),            # x row tile
                pl.BlockSpec(packed_params.shape, lambda i: (0, 0)),  # params (constant block)
            ],
            out_specs=pl.BlockSpec((bm, LANES), lambda i: (i, 0)),
        ),
        compiler_params=pltpu.CompilerParams(dimension_semantics=("parallel",)),
        cost_estimate=cost,
    )(x2d, packed_params)

    # Single tiny slice drops the zero-padded lanes; the reshape back is free.
    return out_pad[:, :hid].reshape(*lead, hid)


# ---------------------------------------------------------------------------
# Example / self-check
# ---------------------------------------------------------------------------
if __name__ == "__main__":
    key = jax.random.PRNGKey(0)
    kx, k1, kb1, k2, kb2 = jax.random.split(key, 5)

    x = jax.random.normal(kx, (B, S, HID_DIM), dtype=jnp.float32)
    w1 = jax.random.normal(k1, (HID_DIM, PF_DIM), dtype=jnp.float32) * 0.05
    b1 = jax.random.normal(kb1, (PF_DIM,), dtype=jnp.float32) * 0.05
    w2 = jax.random.normal(k2, (PF_DIM, HID_DIM), dtype=jnp.float32) * 0.05
    b2 = jax.random.normal(kb2, (HID_DIM,), dtype=jnp.float32) * 0.05

    params, meta = pack_ffn_params(w1, b1, w2, b2)   # done once; reused across calls
    out = positionwise_ffn(x, params, meta)
    out = jax.block_until_ready(out)

    # Pure-JAX reference (fc_1 -> relu -> fc_2; dropout identity).
    ref = jnp.maximum(x.reshape(-1, HID_DIM) @ w1 + b1, 0.0) @ w2 + b2
    ref = ref.reshape(B, S, HID_DIM)

    assert out.shape == (B, S, HID_DIM), out.shape
    assert jnp.all(jnp.isfinite(out))
    err = float(jnp.max(jnp.abs(out - ref)))
    assert jnp.allclose(out, ref, atol=1e-5, rtol=1e-5), err
    print("KERNEL_OK")
</pallas_src>

<mosaic_0001>
module attributes {stable_mosaic.version = 11 : i64} {
  func.func @ffn_kernel(%arg0: i32, %arg1: memref<8x32xf32, #tpu.memory_space<vmem>>, %arg2: memref<176x128xf32, #tpu.memory_space<vmem>>, %arg3: memref<8x128xf32, #tpu.memory_space<vmem>>) attributes {dimension_semantics = [#tpu.dimension_semantics<parallel>], iteration_bounds = array<i64: 2>, scalar_prefetch = 0 : i64, scratch_operands = 0 : i64, tpu.core_type = #tpu.core_type<tc>, window_params = [{transform_indices = @transform_0, window_bounds = array<i64: 8, 32>}, {pipeline_mode = #tpu.pipeline_mode<synchronous>, transform_indices = @transform_1, window_bounds = array<i64: 176, 128>}, {transform_indices = @transform_2, window_bounds = array<i64: 8, 128>}]} {
    %c0 = arith.constant 0 : index
    %c0_0 = arith.constant 0 : index
    %0 = vector.load %arg1[%c0, %c0_0] : memref<8x32xf32, #tpu.memory_space<vmem>>, vector<8x32xf32>
    %c0_1 = arith.constant 0 : index
    %c0_2 = arith.constant 0 : index
    %1 = vector.load %arg2[%c0_1, %c0_2] : memref<176x128xf32, #tpu.memory_space<vmem>>, vector<32x128xf32>
    %c32 = arith.constant 32 : index
    %c0_3 = arith.constant 0 : index
    %2 = vector.load %arg2[%c32, %c0_3] : memref<176x128xf32, #tpu.memory_space<vmem>>, vector<128x128xf32>
    %c160 = arith.constant 160 : index
    %c0_4 = arith.constant 0 : index
    %3 = vector.load %arg2[%c160, %c0_4] : memref<176x128xf32, #tpu.memory_space<vmem>>, vector<1x128xf32>
    %c168 = arith.constant 168 : index
    %c0_5 = arith.constant 0 : index
    %4 = vector.load %arg2[%c168, %c0_5] : memref<176x128xf32, #tpu.memory_space<vmem>>, vector<1x128xf32>
    %cst = arith.constant dense<0.000000e+00> : vector<8x128xf32>
    %5 = tpu.matmul %0, %1, %cst {dimension_numbers = #tpu.dot_dimension_numbers<[1], [0], [0], [1], [0, 0, 1, 1], [], []>} : vector<8x32xf32>, vector<32x128xf32>, vector<8x128xf32> -> vector<8x128xf32>
    %6 = vector.broadcast %3 : vector<1x128xf32> to vector<8x128xf32>
    %7 = arith.addf %5, %6 : vector<8x128xf32>
    %cst_6 = arith.constant 0.000000e+00 : f32
    %8 = vector.broadcast %cst_6 : f32 to vector<8x128xf32>
    %9 = arith.maximumf %7, %8 : vector<8x128xf32>
    %cst_7 = arith.constant dense<0.000000e+00> : vector<8x128xf32>
    %10 = tpu.matmul %9, %2, %cst_7 {dimension_numbers = #tpu.dot_dimension_numbers<[1], [0], [0], [1], [0, 0, 1, 1], [], []>} : vector<8x128xf32>, vector<128x128xf32>, vector<8x128xf32> -> vector<8x128xf32>
    %11 = vector.broadcast %4 : vector<1x128xf32> to vector<8x128xf32>
    %12 = arith.addf %10, %11 : vector<8x128xf32>
    %c0_8 = arith.constant 0 : index
    %c0_9 = arith.constant 0 : index
    %13 = vector.load %arg3[%c0_8, %c0_9] : memref<8x128xf32, #tpu.memory_space<vmem>>, vector<8x128xf32>
    tpu.vector_store %arg3[%c0_8, %c0_9], %12 {strides = array<i32>} : memref<8x128xf32, #tpu.memory_space<vmem>>, vector<8x128xf32>,
    return
  }
  func.func @transform_0(%arg0: i32) -> (i32, i32) {
    %c0_i32 = arith.constant 0 : i32
    %c0_i32_0 = arith.constant 0 : i32
    return %arg0, %c0_i32 : i32, i32
  }
  func.func @transform_1(%arg0: i32) -> (i32, i32) {
    %c0_i32 = arith.constant 0 : i32
    %c0_i32_0 = arith.constant 0 : i32
    %c0_i32_1 = arith.constant 0 : i32
    return %c0_i32, %c0_i32_0 : i32, i32
  }
  func.func @transform_2(%arg0: i32) -> (i32, i32) {
    %c0_i32 = arith.constant 0 : i32
    %c0_i32_0 = arith.constant 0 : i32
    return %arg0, %c0_i32 : i32, i32
  }
}

</mosaic_0001>

<bundles_post_ra>
// kernel: tpu_custom_call.1
= control target key start
LH: loop header
LB: loop body
LE: loop exit
PB: predicated region body
PF: predicated region fallthrough
CT: control target
= control target key end

     0   :  { %7 = vsyncpa [#allocation3], 0  ;;  %s978_s0 = inlined_call_operand.hbm [shape: f32[16,32], index: 0, kind: input, shape index: {}]   ;;  %s979_s1 = inlined_call_operand.hbm [shape: f32[176,128], index: 1, kind: input, shape index: {}]   ;;  %s980_s2 = inlined_call_operand.hbm [shape: f32[16,128], index: 2, kind: output, shape index: {}]  }
   0x1   :  { %9 = vsyncpa [#allocation3 + $0x1], 0 }
   0x2   :  { %10 = vsyncpa [#allocation6], 0 }
   0x3   :  { %11 = vsyncpa [#allocation4], 0 }
   0x4   :  { %13 = vsyncpa [#allocation4 + $0x1], 0  ;;  %s775_s9 = smov 0   ;;  %s777_s10 = smov 0  }
   0x5   :  { %s779_s11 = smov 0   ;;  %s781_s12 = smov 0  }
   0x6 LB: > { %s796_s13 = sadd.s32 4294967295, %s750_s12   ;;  %s445_s14 = sadd.s32 4294967294, %s750_s12   ;;  %s750_s12 = sphi %s781_s12, %s1000_s12   ;;  %s746_s11 = sphi %s779_s11, %s999_s11   ;;  %s742_s10 = sphi %s777_s10, %s998_s10   ;;  %s738_s9 = sphi %s775_s9, %s997_s9  }
   0x7   : > { %p39_p0 = scmp.ne.s32.totalorder %s742_s10, %s738_s9  ;;  %p981_p1 = scmp.eq.s32.totalorder %s796_s13, 0 }
   0x8   : > { %p90_p3 = scmp.eq.s32.totalorder %s445_s14, 1  ;;  %p446_p5 = scmp.ge.s32.totalorder %s750_s12, 1 }
   0x9   : > { %p805_p4 = por %p981_p1, %p39_p0  ;;  %p97_p7 = scmp.lt.s32.totalorder %s750_s12, 3 }
   0xa   : > { %p810_p6 = por %p90_p3, %p39_p0  ;;  %s752_s18 = smov [#allocation5]  }
   0xb   : > { %s984_s15 = scalar_select %p805_p4, 1, 0 }
   0xc   : > { %s985_s16 = scalar_select %p810_p6, 1, 0 }
   0xd   : > { %p815_p8 = pnand %p446_p5, %p97_p7  ;;  %s109_s19 = sshll.u32 %s752_s18, 4  ;;  %s819_s19 = int_to_ptr.vmem [resolvable:$true] %s109_s19 }
   0xe   : > { %s831_s21 = sadd.s32 1, %s750_s12   ;;  %s26_s22 = sadd.s32 1, %s746_s11 }
   0xf   : > { %s986_s17 = scalar_select %p815_p8, 1, 0 }
  0x10   : > { %p568_p9 = pneg %p815_p8  ;;  %s23_s23 = ssub.s32 %s750_s12, %s831_s21 }
  0x11   : > { %s622_s26 = scalar_lea.hbm %s979_s1, 2816 }
  0x12   : > { %p826_p11 = pnand %p568_p9, %p981_p1  ;;  %p623_p12 = scmp.ne.s32.totalorder %s979_s1, %s622_s26 }
  0x13   : > { %p629_p5 = scmp.lt.u32.totalorder %s622_s26, %s979_s1 }
  0x14   : > { %p624_p13 = pneg %p826_p11 }
  0x16   : > { %p625_p0 = pnand %p624_p13, %p623_p12 }
  0x18   : > { %p626_p3 = pneg %p625_p0 }
  0x1a   : > { %p631_p7 = pnand %p629_p5, %p626_p3 }
  0x1c   : > { %634 = shalt.err (!%p631_p7)
}
  0x1d   : > { %s635_s3 = scalar_lea.vmem %s819_s19, 2816  ;;  %p643_p2 = scmp.lt.s32.totalorder %s819_s19, %s819_s19 }
  0x1e   : > { %p636_p9 = scmp.ne.s32.totalorder %s819_s19, %s635_s3  ;;  %p644_p6 = scmp.lt.s32.totalorder %s635_s3, %s635_s3 }
  0x20   : > { %p638_p10 = pnand %p636_p9, %p624_p13  ;;  %p645_p4 = por %p644_p6, %p643_p2 }
  0x22   : > { %p639_p1 = pneg %p638_p10 }
  0x24   : > { %p646_p8 = pnand %p645_p4, %p639_p1 }
  0x26   : > { %649 = shalt.err (!%p646_p8)
}
  0x27   : > { %s753_s4 = smov 128   ;;  %s754_s5 = smov 8  }
  0x28   : > { %571 = dma.hbm_to_vmem [thread:$0]  (!%p826_p11), %s979_s1, 2816, %s819_s19, [#allocation6], %s753_s4, %s753_s4, %s754_s5  }
  0x29   : > { %p24_p2 = scmp.eq.s32.totalorder %s23_s23, 0  ;;  %p33_p1 = scmp.ne.s32.totalorder %s746_s11, %s742_s10 }
  0x2a   : > { %p34_p4 = scmp.eq.s32.totalorder %s750_s12, 0  ;;  %p581_p6 = scmp.lt.s32.totalorder %s750_s12, 2 }
  0x2b   : > { %s862_s8 = scalar_select %p24_p2, %s746_s11, %s26_s22  }
  0x2c   : > { %p35_p8 = por %p34_p4, %p33_p1  ;;  %p988_p10 = scmp.eq.s32.totalorder %s796_s13, 1 }
  0x2d   : > { %s123_s18 = sand.u32 1, %s746_s11   ;;  %s450_s24 = sshll.u32 %s750_s12, 7 }
  0x2e   : > { %p866_p12 = por %p988_p10, %p33_p1  ;;  %s449_s25 = sshll.u32 %s123_s18, 3 }
  0x2f   : > { %s875_s27 = scalar_lea.hbm %s978_s0, %s450_s24  ;;  %s127_s19 = scalar_lea.vmem [#allocation2], %s449_s25 }
  0x30   : > { %s134_s22 = sshll.u32 %s127_s19, 4  ;;  %p877_p11 = pnand %p581_p6, %p35_p8  ;;  %s881_s22 = int_to_ptr.vmem [resolvable:$true] %s134_s22 }
  0x31   : > { %s124_s28 = scalar_lea.sflag [#allocation3], %s123_s18  ;;  %s650_s29 = scalar_lea.hbm %s875_s27, 128 }
  0x32   : > { %p651_p13 = scmp.ne.s32.totalorder %s875_s27, %s650_s29  ;;  %p652_p0 = pneg %p877_p11 }
  0x33   : > { %s655_s4 = scalar_lea.hbm %s978_s0, 256  ;;  %p656_p7 = scmp.lt.u32.totalorder %s875_s27, %s978_s0 }
  0x34   : > { %p653_p3 = pnand %p652_p0, %p651_p13  ;;  %p657_p9 = scmp.lt.u32.totalorder %s655_s4, %s650_s29 }
  0x35   : > { %p659_p1 = scmp.lt.u32.totalorder %s650_s29, %s875_s27 }
  0x36   : > { %p654_p5 = pneg %p653_p3  ;;  %p658_p2 = por %p657_p9, %p656_p7 }
  0x38   : > { %p660_p4 = por %p659_p1, %p658_p2 }
  0x3a   : > { %p661_p6 = pnand %p660_p4, %p654_p5 }
  0x3c   : > { %664 = shalt.err (!%p661_p6)
}
  0x3d   : > { %s665_s7 = scalar_lea.vmem %s881_s22, 128  ;;  %s755_s18 = smov [#allocation2]  }
  0x3e   : > { %p666_p8 = scmp.ne.s32.totalorder %s881_s22, %s665_s7  ;;  %s670_s24 = sshll.u32 %s755_s18, 4  ;;  %s671_s24 = int_to_ptr.vmem [resolvable:$false] %s670_s24 }
  0x3f   : > { %s672_s25 = scalar_lea.vmem %s671_s24, 256  ;;  %p673_p3 = scmp.lt.s32.totalorder %s881_s22, %s671_s24 }
  0x40   : > { %p668_p10 = pnand %p666_p8, %p652_p0  ;;  %p674_p7 = scmp.lt.s32.totalorder %s672_s25, %s665_s7 }
  0x42   : > { %p669_p13 = pneg %p668_p10  ;;  %p675_p9 = por %p674_p7, %p673_p3 }
  0x44   : > { %p676_p2 = pnand %p675_p9, %p669_p13 }
  0x46   : > { %679 = shalt.err (!%p676_p2)
}
  0x47   : > { %575 = dma.hbm_to_vmem [thread:$0]  (!%p877_p11), %s875_s27, 128, %s881_s22, %s124_s28  }
  0x48   : > { %p991_p5 = scmp.ne.s32.totalorder %s986_s17, 0 }
  0x49   : > { %s911_s20 = sand.u32 (!%p991_p5), 1, %s742_s10   ;;  %p992_p0 = scmp.ne.s32.totalorder (!%p991_p5), %s984_s15, 0 }
  0x4a   : > { %143 = sbr.rel (%p991_p5) target bundleno = 539 (0x21b), region = 28  ;;  %s452_s26 = sshll.u32 (!%p991_p5), %s911_s20, 3 }
  0x4b   : > { %s146_s19 = scalar_lea.sflag (!%p991_p5), [#allocation3], %s911_s20  ;;  %s917_s29 = scalar_lea.vmem (!%p991_p5), [#allocation2], %s452_s26 }
  0x51   : > { %725 = dma.done.wait (%p992_p0), %s146_s19, 128  }
  0x52   : > { %727 = vsyncadd (%p992_p0), %s146_s19, 4294967168  ;;  %p993_p11 = scmp.eq.s32.totalorder %s796_s13, 0 }
  0x54   : > { %729 = dma.done.wait (%p993_p11), [#allocation6], 2816   ;;  %p994_p1 = pmov %p993_p11 }
  0x55   : > { %v756_v0 = vmov 0.0|0.0   ;;  %vm757_vm0 = vmmov 0   ;;  %v758_v1 = vmov 0.0   ;;  %v175_v2 = vld [vmem:[#allocation5] sm:$0xff]  ;;  %v176_v3 = vld [vmem:[#allocation5 + $0x8] sm:$0xff]  ;;  %v177_v4 = vld [vmem:[#allocation5 + $0x10] sm:$0xff] }
  0x56   : > { %731 = vsyncadd (%p994_p1), [#allocation6], 4294964480  ;;  %530 = vmatprep.subr.bf16.mxu0 %v756_v0  ;;  %492 = vmatprep.mubr.msk.f32.mxu0 %vm757_vm0, %v758_v1  ;;  %v531_v5 = vpack.c.bf16 %v176_v3, %v175_v2  ;;  %v178_v6 = vld [vmem:[#allocation5 + $0x18] sm:$0xff]  ;;  %v179_v7 = vld [vmem:[#allocation5 + $0x20] sm:$0xff]  ;;  %vm201_vm1 = vcmask 261120   ;;  %s459_s15 = sshll.u32 %s796_s13, 7 }
  0x57   : > { %536 = vmatprep.subr.bf16.mxu1 %v756_v0  ;;  %527 = vmatprep.mubr.msk.f32.mxu1 %vm757_vm0, %v758_v1  ;;  %v180_v8 = vld [vmem:[#allocation5 + $0x28] sm:$0xff]  ;;  %v181_v9 = vld [vmem:[#allocation5 + $0x30] sm:$0xff]  ;;  %v182_v10 = vld [vmem:[#allocation5 + $0x38] sm:$0xff]  ;;  %v534_v11 = vpack.c.bf16 %v178_v6, %v177_v4  ;;  %s173_s17 = scalar_lea.vmem [#allocation7], %s452_s26  ;;  %s934_s28 = scalar_lea.hbm %s980_s2, %s459_s15 }
  0x58   : > { %532 = vmatpush3.bf16.msra.mxu0 %v531_v5  ;;  %v537_v12 = vpack.c.bf16 %v180_v8, %v179_v7  ;;  %v540_v13 = vpack.c.bf16 %v182_v10, %v181_v9  ;;  %v183_v14 = vld [vmem:[#allocation5 + $0x40] sm:$0xff]  ;;  %v184_v15 = vld [vmem:[#allocation5 + $0x48] sm:$0xff]  ;;  %v174_v16 = vld [vmem:[%s917_s29] sm:$0xff]  ;;  %s365_s27 = sshll.u32 %s173_s17, 4  ;;  %s352_s30 = scalar_lea.sflag [#allocation4], %s911_s20  ;;  %s936_s27 = int_to_ptr.vmem [resolvable:$true] %s365_s27 }
  0x59   : > { %533 = vmatprep.subr.bf16.mxu0 %v756_v0  ;;  %v543_v17 = vpack.c.bf16 %v184_v15, %v183_v14  ;;  %v185_v18 = vld [vmem:[#allocation5 + $0x50] sm:$0xff]  ;;  %v186_v19 = vld [vmem:[#allocation5 + $0x58] sm:$0xff]  ;;  %v187_v21 = vld [vmem:[#allocation5 + $0x60] sm:$0xff]  ;;  %s680_s3 = scalar_lea.vmem %s936_s27, 128  ;;  %s759_s13 = smov [#allocation7]  }
  0x5a   : > { %538 = vmatpush3.bf16.msra.mxu1 %v537_v12  ;;  %v546_v20 = vpack.c.bf16 %v186_v19, %v185_v18  ;;  %v188_v22 = vld [vmem:[#allocation5 + $0x68] sm:$0xff]  ;;  %v189_v24 = vld [vmem:[#allocation5 + $0x70] sm:$0xff]  ;;  %v190_v25 = vld [vmem:[#allocation5 + $0x78] sm:$0xff]  ;;  %p681_p4 = scmp.ne.s32.totalorder %s936_s27, %s680_s3  ;;  %s684_s4 = sshll.u32 %s759_s13, 4  ;;  %s685_s4 = int_to_ptr.vmem [resolvable:$false] %s684_s4 }
  0x5b   : > { %539 = vmatprep.subr.bf16.mxu1 %v756_v0  ;;  %v549_v23 = vpack.c.bf16 %v188_v22, %v187_v21  ;;  %v552_v26 = vpack.c.bf16 %v190_v25, %v189_v24  ;;  %v191_v27 = vld [vmem:[#allocation5 + $0x80] sm:$0xff]  ;;  %v192_v28 = vld [vmem:[#allocation5 + $0x88] sm:$0xff]  ;;  %v193_v30 = vld [vmem:[#allocation5 + $0x90] sm:$0xff]  ;;  %s686_s5 = scalar_lea.vmem %s685_s4, 256  ;;  %p687_p10 = scmp.lt.s32.totalorder %s936_s27, %s685_s4 }
  0x5c   : > { %535 = vmatpush3.bf16.msra.mxu0 %v534_v11  ;;  %v555_v29 = vpack.c.bf16 %v192_v28, %v191_v27  ;;  %v194_v31 = vld [vmem:[#allocation5 + $0x98] sm:$0xff]  ;;  %v455_v33 = vld [vmem:[#allocation5 + $0xa0] ss:$0 sm:$0xff]  ;;  %v457_v38 = vld [vmem:[#allocation5 + $0xa8] ss:$0 sm:$0xff]  ;;  %p682_p6 = pnand %p681_p4, %p866_p12  ;;  %p688_p13 = scmp.lt.s32.totalorder %s686_s5, %s680_s3 }
  0x5d   : > { %v558_v32 = vpack.c.bf16 %v194_v31, %v193_v30 }
  0x5e   : > { %541 = vmatpush3.bf16.msra.mxu1 %v540_v13  ;;  %p683_p8 = pneg %p682_p6  ;;  %p689_p3 = por %p688_p13, %p687_p10 }
  0x5f   : > { %493 = vmatmul.mubr.msk.f32.vlgmr.msra.gmra.mrb[0].mxu0 %vm201_vm1, %v174_v16  ;;  %542 = vmatprep.subr.bf16.mxu1 %v756_v0 }
  0x60   : > { %p690_p7 = pnand %p689_p3, %p683_p8 }
  0x62   : > { %544 = vmatpush3.bf16.msra.mxu1 %v543_v17 }
  0x63   : > { %545 = vmatprep.subr.bf16.mxu1 %v756_v0 }
  0x66   : > { %547 = vmatpush3.bf16.msra.mxu1 %v546_v20 }
  0x67   : > { %548 = vmatprep.subr.bf16.mxu1 %v756_v0 }
  0x6a   : > { %550 = vmatpush3.bf16.msra.mxu1 %v549_v23 }
  0x6b   : > { %551 = vmatprep.subr.bf16.mxu1 %v756_v0 }
  0x6e   : > { %553 = vmatpush3.bf16.msra.mxu1 %v552_v26 }
  0x6f   : > { %554 = vmatprep.subr.bf16.mxu1 %v756_v0 }
  0x72   : > { %556 = vmatpush3.bf16.msra.mxu1 %v555_v29 }
  0x73   : > { %557 = vmatprep.subr.bf16.mxu1 %v756_v0 }
  0x76   : > { %559 = vmatpush3.bf16.msra.mxu1 %v558_v32 }
 0x132   : > { %v271_v34 = vpop.f32.mrb[0].mxu0 }
 0x133   : > { %v272_v35 = vadd.f32 %v455_v33, %v271_v34  ;;  %v494_v36 = vpop.f32.mrb[1].mxu0 }
 0x135   : > { %v275_v37 = vmax.f32 %v272_v35, 0.0 }
 0x137   : > { %528 = vmatmul.mubr.f32.vlgmr.msra.gmra.mrb[0].mxu1 %v275_v37 }
 0x20a   : > { %v346_v39 = vpop.f32.mrb[0].mxu1 }
 0x20b   : > { %v347_v40 = vadd.f32 %v457_v38, %v346_v39  ;;  %v529_v41 = vpop.f32.mrb[1].mxu1 }
 0x20d   : > { %350 = vst [vmem:[%s173_s17] sm:$0xff] %v347_v40 }
 0x20e   : > { %693 = shalt.err (!%p690_p7)
}
 0x20f   : > { %s694_s6 = scalar_lea.hbm %s934_s28, 128  ;;  %s698_s24 = scalar_lea.hbm %s980_s2, 256 }
 0x210   : > { %p695_p9 = scmp.ne.s32.totalorder %s934_s28, %s694_s6  ;;  %p699_p0 = scmp.lt.u32.totalorder %s934_s28, %s980_s2 }
 0x211   : > { %p700_p11 = scmp.lt.u32.totalorder %s698_s24, %s694_s6  ;;  %p702_p4 = scmp.lt.u32.totalorder %s694_s6, %s934_s28 }
 0x212   : > { %p696_p2 = pnand %p695_p9, %p866_p12 }
 0x213   : > { %p701_p1 = por %p700_p11, %p699_p0 }
 0x214   : > { %p697_p5 = pneg %p696_p2 }
 0x215   : > { %p703_p6 = por %p702_p4, %p701_p1 }
 0x217   : > { %p704_p8 = pnand %p703_p6, %p697_p5 }
 0x219   : > { %707 = shalt.err (!%p704_p8)
}
 0x21a   : > { %566 = dma.vmem_to_hbm [thread:$0]  (%p866_p12), %s936_s27, 128, %s934_s28, %s352_s30  }
 0x21b PF: > { %s377_s26 = sand.u32 1, %s738_s9   ;;  %p995_p10 = scmp.ne.s32.totalorder %s985_s16, 0 }
 0x21c   : > { %p996_p13 = scmp.ge.s32.totalorder %s750_s12, 2  ;;  %s378_s19 = scalar_lea.sflag [#allocation4], %s377_s26 }
 0x21e   : > { %p577_p3 = pnand %p996_p13, %p995_p10 }
 0x220   : > { %733 = dma.done.wait (!%p577_p3), %s378_s19, 128  }
 0x221   : > { %735 = vsyncadd (!%p577_p3), %s378_s19, 4294967168  ;;  %p16_p7 = scmp.ge.s32.totalorder %s831_s21, 4   ;;  %s997_s9 = smov %s742_s10 }
 0x222   : > { %s998_s10 = smov %s746_s11  ;;  %s999_s11 = smov %s862_s8 }
 0x223   : > { %s1000_s12 = smov %s831_s21  ;;  %18 = sbr.rel (!%p16_p7) target bundleno = 6 (0x6), region = 77 }
 0x22a   :  { %383 = vsyncpa [#allocation3], 1 }
 0x22b   :  { %385 = vsyncpa [#allocation3 + $0x1], 1 }
 0x22c   :  { %386 = vsyncpa [#allocation6], 1 }
 0x22d   :  { %387 = vsyncpa [#allocation4], 1 }
 0x22e   :  { %389 = vsyncpa [#allocation4 + $0x1], 1 }

</bundles_post_ra>
